<compile_context>
chip_gen: v7x
topology: tpu7x:2x2x1
jax: 0.10.0
libtpu: 0.0.40
codegen_flags: <defaults>
</compile_context>

<pallas_src>
import numpy as np
import jax
import jax.numpy as jnp
from jax import lax
from jax.experimental import pallas as pl
from jax.experimental.pallas import tpu as pltpu

UNK_IDX = 0  # vocab[0] = <unk>
PAD_IDX = 1  # vocab[1] = <pad>


def _detect_runs(vocab_codes):
    """Group the static vocab (code -> index) into maximal contiguous-code runs.

    Returns a list of (code_lo, code_hi, idx_lo): codes in [code_lo, code_hi]
    map to idx_lo + (code - code_lo).  Negative sentinel codes (special tokens
    such as <unk>/<pad>) are skipped — they never appear as real token codes,
    which is also what makes the unsigned range-check in the kernel valid.
    """
    codes = [int(c) for c in np.asarray(vocab_codes).reshape(-1)]
    nonneg = [c for c in codes if c >= 0]
    if len(set(nonneg)) != len(nonneg):
        # ScriptVocabulary (dict) keeps the first duplicate; the chained-where
        # lookup would keep the last — reject ambiguous vocabs outright.
        raise ValueError("duplicate token codes in vocabulary")
    runs = []
    i, V = 0, len(codes)
    while i < V:
        if codes[i] < 0:
            i += 1
            continue
        j = i
        while j + 1 < V and codes[j + 1] >= 0 and codes[j + 1] == codes[j] + 1:
            j += 1
        runs.append((codes[i], codes[j], i))
        i = j + 1
    return runs


def _make_kernel(runs, unk_idx, pad_idx, block_t):
    """Fused kernel: lookup_indices_1d + pad_2d(pad_idx) + pad_2d(-1) on positions."""

    def kernel(codes_ref, lens_ref, starts_ref, ends_ref,
               tok_ref, st_ref, en_ref):
        j = pl.program_id(1)                         # token-axis block index
        codes = codes_ref[...].astype(jnp.int32)     # int16/int8 input cast on-chip

        # pad_2d mask: subtract the tile offset from the tiny [bB,1] lens
        # operand (1 op) instead of adding it to the full-tile iota.
        lens_local = lens_ref[...] - j * jnp.int32(block_t)
        valid = lax.broadcasted_iota(jnp.int32, codes.shape, 1) < lens_local

        # dict.get(token, unk_idx): init UNK once, then one unsigned
        # range-check + arithmetic map per contiguous vocab run (single
        # equality compare for isolated entries).
        result = jnp.full(codes.shape, jnp.int32(unk_idx), dtype=jnp.int32)
        for c_lo, c_hi, i_lo in runs:
            if c_lo == c_hi:
                result = jnp.where(codes == c_lo, jnp.int32(i_lo), result)
            else:
                delta = codes - jnp.int32(c_lo)
                hit = delta.astype(jnp.uint32) <= jnp.uint32(c_hi - c_lo)
                result = jnp.where(hit, delta + jnp.int32(i_lo), result)

        tok_ref[...] = jnp.where(valid, result, jnp.int32(pad_idx))
        st_ref[...] = jnp.where(valid, starts_ref[...], jnp.int32(-1))
        en_ref[...] = jnp.where(valid, ends_ref[...], jnp.int32(-1))

    return kernel


def _choose_tiles(B, T, codes_itemsize, block_b=None, block_t=None):
    """Pick (bB, bT): lane-dense, VMEM-budgeted, >=2 blocks for v7x when possible."""
    sub = {1: 32, 2: 16, 4: 8}.get(codes_itemsize, 8)   # sublane multiple per dtype
    max_tile_elems = 512 * 1024                         # ~2 MiB per int32 tile
    t_single_cap = 4096                                 # single token block up to here

    if block_t is not None:
        bT = min(block_t, T)
        if bT != T:
            assert bT % 128 == 0, "block_t must be a multiple of 128 (or >= T)"
    else:
        bT = T if T <= t_single_cap else 2048           # contiguous rows when small

    if block_b is not None:
        bB = min(block_b, B)
        if bB != B:
            assert bB % sub == 0, f"block_b must be a multiple of {sub} (or >= B)"
    else:
        bB_budget = max(sub, (max_tile_elems // bT) // sub * sub)
        bB = B if B <= bB_budget else bB_budget

    # v7x has 2 TensorCores: make sure at least one "parallel" axis has >= 2
    # blocks when the shape allows it (costs one ~0.35 us grid step elsewhere).
    if block_b is None and block_t is None and pl.cdiv(B, bB) * pl.cdiv(T, bT) == 1:
        if B >= 2 * sub:
            bB = ((pl.cdiv(B, 2) + sub - 1) // sub) * sub
        elif T >= 256:
            bT = ((pl.cdiv(T, 2) + 127) // 128) * 128
    return bB, bT


def token_tensorize(vocab_codes, token_codes, seq_lens, token_starts, token_ends,
                    *, unk_idx=UNK_IDX, pad_idx=PAD_IDX,
                    block_b=None, block_t=None,
                    positions_layout="BT2", donate_inputs=False,
                    vmem_limit_bytes=None):
    """TokenTensorizerScriptImpl.forward (numeric path).

    vocab_codes  : static [V] int — integer code per vocab token (negative
                   sentinel for special tokens).
    token_codes  : [B, T] int32/int16/int8 — integer code per (row, token slot)
    seq_lens     : [B]    int — real tokens per row
    token_starts : [B, T] int — start offsets from tokenize()
    token_ends   : [B, T] int — end offsets from tokenize()
    positions_layout: "BT2" (PyTorch-shaped [B,T,2]) or "2BT" (skips the
                   size-2 minor-dim interleave; cheaper if downstream allows).
    donate_inputs: alias codes/starts/ends buffers to the outputs (only use
                   when the caller truly donates them).

    Returns (token_indices [B,T] i32, seq_lens [B] i32, positions i32).
    """
    B, T = token_codes.shape
    runs = _detect_runs(vocab_codes)

    if np.dtype(token_codes.dtype) not in (np.dtype(np.int8), np.dtype(np.int16),
                                           np.dtype(np.int32)):
        token_codes = token_codes.astype(jnp.int32)
    lens_2d = seq_lens.astype(jnp.int32).reshape(B, 1)
    starts = token_starts.astype(jnp.int32)
    ends = token_ends.astype(jnp.int32)

    bB, bT = _choose_tiles(B, T, np.dtype(token_codes.dtype).itemsize, block_b, block_t)
    grid = (pl.cdiv(B, bB), pl.cdiv(T, bT))

    if vmem_limit_bytes is None:
        # 6 big tiles (3 in + 3 out) x double-buffering x 4 B/elem, plus headroom.
        tile_bytes = bB * bT * 4
        vmem_limit_bytes = min(int(12 * tile_bytes) + (8 << 20), 48 << 20)

    kernel = _make_kernel(runs, int(unk_idx), int(pad_idx), bT)

    big_spec = pl.BlockSpec((bB, bT), lambda i, j: (i, j))
    len_spec = pl.BlockSpec((bB, 1), lambda i, j: (i, 0))

    io_aliases = {}
    if donate_inputs:
        if np.dtype(token_codes.dtype) == np.dtype(np.int32):
            io_aliases[0] = 0          # codes  -> token_indices
        io_aliases[2] = 1              # starts -> masked starts
        io_aliases[3] = 2              # ends   -> masked ends

    tok, st, en = pl.pallas_call(
        kernel,
        out_shape=(jax.ShapeDtypeStruct((B, T), jnp.int32),) * 3,
        grid_spec=pltpu.PrefetchScalarGridSpec(
            num_scalar_prefetch=0,
            grid=grid,
            in_specs=[big_spec, len_spec, big_spec, big_spec],
            out_specs=[big_spec, big_spec, big_spec],
        ),
        compiler_params=pltpu.CompilerParams(
            dimension_semantics=("parallel", "parallel"),
            vmem_limit_bytes=vmem_limit_bytes,
        ),
        input_output_aliases=io_aliases,
    )(token_codes, lens_2d, starts, ends)

    seq_lens_out = seq_lens.astype(jnp.int32)
    if positions_layout == "2BT":
        positions = jnp.stack([st, en], axis=0)     # lane-dense, no interleave pass
    else:
        positions = jnp.stack([st, en], axis=2)     # PyTorch API shape [B,T,2]
    return tok, seq_lens_out, positions


if __name__ == "__main__":
    # Vocabulary: <unk>, <pad> (negative sentinel codes) + single-character
    # tokens 'a'..'z' and ' ' identified by their codepoint.  'a'..'z' form a
    # contiguous run (arithmetic map); ' ' exercises the isolated-entry path.
    alphabet = "abcdefghijklmnopqrstuvwxyz "
    vocab_codes = np.array([-1, -2] + [ord(ch) for ch in alphabet], dtype=np.int32)
    idx_map = {ord(ch): i + 2 for i, ch in enumerate(alphabet)}

    def reference(codes_np, lens_np, starts_np, ends_np):
        # Mirrors ScriptVocabulary.lookup_indices_1d + pad_2d (+ -1 positions).
        Bb, Tt = codes_np.shape
        tok = np.full((Bb, Tt), PAD_IDX, np.int32)
        pos = np.full((Bb, Tt, 2), -1, np.int32)
        for b in range(Bb):
            for t in range(int(lens_np[b])):
                tok[b, t] = idx_map.get(int(codes_np[b, t]), UNK_IDX)
                pos[b, t, 0] = starts_np[b, t]
                pos[b, t, 1] = ends_np[b, t]
        return tok, lens_np.astype(np.int32), pos

    def run_case(key, B, T, codes_dtype=jnp.int32, **kw):
        k1, k2, k3 = jax.random.split(key, 3)
        seq_lens = jax.random.randint(k1, (B,), 1, T + 1).astype(jnp.int32)
        # Token codes: mostly in-vocab codepoints, some > 'z' to hit the UNK path.
        codes = jax.random.randint(k2, (B, T), ord("a"), ord("z") + 5).astype(codes_dtype)
        # Sprinkle spaces to exercise the isolated-vocab-entry path.
        codes = jnp.where(jax.random.bernoulli(k3, 0.1, (B, T)),
                          jnp.asarray(ord(" "), codes_dtype), codes).astype(codes_dtype)
        # Synthetic start/end offsets (ScriptDoNothingTokenizer would emit -1/-1;
        # non-trivial values exercise the -1 padding path).
        starts = (jnp.arange(T, dtype=jnp.int32)[None, :] * 5
                  + jnp.arange(B, dtype=jnp.int32)[:, None])
        ends = starts + 3

        tok, lens, pos = token_tensorize(vocab_codes, codes, seq_lens, starts, ends, **kw)
        jax.block_until_ready((tok, lens, pos))

        ref_tok, ref_lens, ref_pos = reference(np.asarray(codes).astype(np.int32),
                                               np.asarray(seq_lens),
                                               np.asarray(starts), np.asarray(ends))
        assert np.array_equal(np.asarray(tok), ref_tok), "token indices mismatch"
        assert np.array_equal(np.asarray(lens), ref_lens), "seq_lens mismatch"
        assert np.array_equal(np.asarray(pos), ref_pos), "positions mismatch"

    key = jax.random.PRNGKey(0)
    ka, kb, kc = jax.random.split(key, 3)
    # Spec-sized case: batch=2, max_tokens=8 (single (2,8) full-array block).
    run_case(ka, B=2, T=8)
    # Non-divisible shapes + forced small tiles: partial edge blocks on both
    # grid axes validate the no-padding / dropped-OOB-write path.
    run_case(kb, B=13, T=300, block_b=8, block_t=128)
    # int16 token codes (v5e/v6e bandwidth opt) with auto-chosen tiles
    # (token axis split into 2 blocks for v7x megacore, partial edge block).
    run_case(kc, B=16, T=300, codes_dtype=jnp.int16)
    print("KERNEL_OK")
</pallas_src>

<mosaic_0001>
module attributes {stable_mosaic.version = 11 : i64} {
  func.func @kernel(%arg0: i32, %arg1: i32, %arg2: memref<2x8xi32, #tpu.memory_space<vmem>>, %arg3: memref<2x1xi32, #tpu.memory_space<vmem>>, %arg4: memref<2x8xi32, #tpu.memory_space<vmem>>, %arg5: memref<2x8xi32, #tpu.memory_space<vmem>>, %arg6: memref<2x8xi32, #tpu.memory_space<vmem>>, %arg7: memref<2x8xi32, #tpu.memory_space<vmem>>, %arg8: memref<2x8xi32, #tpu.memory_space<vmem>>) attributes {dimension_semantics = [#tpu.dimension_semantics<parallel>, #tpu.dimension_semantics<parallel>], iteration_bounds = array<i64: 1, 1>, scalar_prefetch = 0 : i64, scratch_operands = 0 : i64, tpu.core_type = #tpu.core_type<tc>, window_params = [{transform_indices = @transform_0, window_bounds = array<i64: 2, 8>}, {transform_indices = @transform_1, window_bounds = array<i64: 2, 1>}, {transform_indices = @transform_2, window_bounds = array<i64: 2, 8>}, {transform_indices = @transform_3, window_bounds = array<i64: 2, 8>}, {transform_indices = @transform_4, window_bounds = array<i64: 2, 8>}, {transform_indices = @transform_5, window_bounds = array<i64: 2, 8>}, {transform_indices = @transform_6, window_bounds = array<i64: 2, 8>}]} {
    %c0 = arith.constant 0 : index
    %c0_0 = arith.constant 0 : index
    %0 = vector.load %arg2[%c0, %c0_0] : memref<2x8xi32, #tpu.memory_space<vmem>>, vector<2x8xi32>
    %c0_1 = arith.constant 0 : index
    %c0_2 = arith.constant 0 : index
    %1 = vector.load %arg3[%c0_1, %c0_2] : memref<2x1xi32, #tpu.memory_space<vmem>>, vector<2x1xi32>
    %c8_i32 = arith.constant 8 : i32
    %2 = arith.muli %arg1, %c8_i32 : i32
    %3 = vector.broadcast %2 : i32 to vector<2x1xi32>
    %4 = arith.subi %1, %3 : vector<2x1xi32>
    %5 = tpu.iota {dimensions = array<i32: 1>} : vector<2x8xi32>
    %6 = vector.broadcast %4 : vector<2x1xi32> to vector<2x8xi32>
    %7 = arith.cmpi slt, %5, %6 : vector<2x8xi32>
    %c0_i32 = arith.constant 0 : i32
    %8 = vector.broadcast %c0_i32 : i32 to vector<2x8xi32>
    %c97_i32 = arith.constant 97 : i32
    %9 = vector.broadcast %c97_i32 : i32 to vector<2x8xi32>
    %10 = arith.subi %0, %9 : vector<2x8xi32>
    %c25_i32 = arith.constant 25 : i32
    %11 = vector.broadcast %c25_i32 : i32 to vector<2x8xi32>
    %12 = arith.cmpi ule, %10, %11 : vector<2x8xi32>
    %c2_i32 = arith.constant 2 : i32
    %13 = vector.broadcast %c2_i32 : i32 to vector<2x8xi32>
    %14 = arith.addi %10, %13 : vector<2x8xi32>
    %15 = arith.select %12, %14, %8 : vector<2x8xi1>, vector<2x8xi32>
    %c32_i32 = arith.constant 32 : i32
    %16 = vector.broadcast %c32_i32 : i32 to vector<2x8xi32>
    %17 = arith.cmpi eq, %0, %16 : vector<2x8xi32>
    %c28_i32 = arith.constant 28 : i32
    %18 = vector.broadcast %c28_i32 : i32 to vector<2x8xi32>
    %19 = arith.select %17, %18, %15 : vector<2x8xi1>, vector<2x8xi32>
    %c1_i32 = arith.constant 1 : i32
    %20 = vector.broadcast %c1_i32 : i32 to vector<2x8xi32>
    %21 = arith.select %7, %19, %20 : vector<2x8xi1>, vector<2x8xi32>
    %c0_3 = arith.constant 0 : index
    %c0_4 = arith.constant 0 : index
    %22 = vector.load %arg6[%c0_3, %c0_4] : memref<2x8xi32, #tpu.memory_space<vmem>>, vector<2x8xi32>
    tpu.vector_store %arg6[%c0_3, %c0_4], %21 {strides = array<i32>} : memref<2x8xi32, #tpu.memory_space<vmem>>, vector<2x8xi32>,
    %c0_5 = arith.constant 0 : index
    %c0_6 = arith.constant 0 : index
    %23 = vector.load %arg4[%c0_5, %c0_6] : memref<2x8xi32, #tpu.memory_space<vmem>>, vector<2x8xi32>
    %c-1_i32 = arith.constant -1 : i32
    %24 = vector.broadcast %c-1_i32 : i32 to vector<2x8xi32>
    %25 = arith.select %7, %23, %24 : vector<2x8xi1>, vector<2x8xi32>
    %c0_7 = arith.constant 0 : index
    %c0_8 = arith.constant 0 : index
    %26 = vector.load %arg7[%c0_7, %c0_8] : memref<2x8xi32, #tpu.memory_space<vmem>>, vector<2x8xi32>
    tpu.vector_store %arg7[%c0_7, %c0_8], %25 {strides = array<i32>} : memref<2x8xi32, #tpu.memory_space<vmem>>, vector<2x8xi32>,
    %c0_9 = arith.constant 0 : index
    %c0_10 = arith.constant 0 : index
    %27 = vector.load %arg5[%c0_9, %c0_10] : memref<2x8xi32, #tpu.memory_space<vmem>>, vector<2x8xi32>
    %c-1_i32_11 = arith.constant -1 : i32
    %28 = vector.broadcast %c-1_i32_11 : i32 to vector<2x8xi32>
    %29 = arith.select %7, %27, %28 : vector<2x8xi1>, vector<2x8xi32>
    %c0_12 = arith.constant 0 : index
    %c0_13 = arith.constant 0 : index
    %30 = vector.load %arg8[%c0_12, %c0_13] : memref<2x8xi32, #tpu.memory_space<vmem>>, vector<2x8xi32>
    tpu.vector_store %arg8[%c0_12, %c0_13], %29 {strides = array<i32>} : memref<2x8xi32, #tpu.memory_space<vmem>>, vector<2x8xi32>,
    return
  }
  func.func @transform_0(%arg0: i32, %arg1: i32) -> (i32, i32) {
    %c0_i32 = arith.constant 0 : i32
    return %arg0, %arg1 : i32, i32
  }
  func.func @transform_1(%arg0: i32, %arg1: i32) -> (i32, i32) {
    %c0_i32 = arith.constant 0 : i32
    %c0_i32_0 = arith.constant 0 : i32
    return %arg0, %c0_i32 : i32, i32
  }
  func.func @transform_2(%arg0: i32, %arg1: i32) -> (i32, i32) {
    %c0_i32 = arith.constant 0 : i32
    return %arg0, %arg1 : i32, i32
  }
  func.func @transform_3(%arg0: i32, %arg1: i32) -> (i32, i32) {
    %c0_i32 = arith.constant 0 : i32
    return %arg0, %arg1 : i32, i32
  }
  func.func @transform_4(%arg0: i32, %arg1: i32) -> (i32, i32) {
    %c0_i32 = arith.constant 0 : i32
    return %arg0, %arg1 : i32, i32
  }
  func.func @transform_5(%arg0: i32, %arg1: i32) -> (i32, i32) {
    %c0_i32 = arith.constant 0 : i32
    return %arg0, %arg1 : i32, i32
  }
  func.func @transform_6(%arg0: i32, %arg1: i32) -> (i32, i32) {
    %c0_i32 = arith.constant 0 : i32
    return %arg0, %arg1 : i32, i32
  }
}

</mosaic_0001>

<bundles_post_ra>
// kernel: tpu_custom_call.1
= control target key start
LH: loop header
LB: loop body
LE: loop exit
PB: predicated region body
PF: predicated region fallthrough
CT: control target
= control target key end

     0   :  { %12 = vsyncpa [#allocation3], 0  ;;  %s266_s0 = inlined_call_operand.vmem [shape: s32[2,8], index: 0, kind: input, shape index: {}]   ;;  %s267_s1 = inlined_call_operand.vmem [shape: s32[2,1], index: 1, kind: input, shape index: {}]   ;;  %s268_s2 = inlined_call_operand.vmem [shape: s32[2,8], index: 2, kind: input, shape index: {}]   ;;  %s269_s3 = inlined_call_operand.vmem [shape: s32[2,8], index: 3, kind: input, shape index: {}]   ;;  %s270_s4 = inlined_call_operand.hbm [shape: s32[2,8], index: 4, kind: output, shape index: {0}]   ;;  %s271_s5 = inlined_call_operand.hbm [shape: s32[2,8], index: 5, kind: output, shape index: {1}]   ;;  %s272_s6 = inlined_call_operand.hbm [shape: s32[2,8], index: 6, kind: output, shape index: {2}]  }
   0x1   :  { %v23_v0 = vld [vmem:[%s267_s1] sm:$0x3] }
   0x2   :  { %13 = vsyncpa [#allocation5], 0  ;;  %v165_v1 = vmov 0   ;;  %v22_v2 = vld [vmem:[%s266_s0] sm:$0x3]  ;;  %v27_v5 = vlaneseq  ;;  %s166_s25 = smov [#allocation4]  }
   0x3   :  { %94 = vset.pattern.permute.xlu0 %v165_v1  ;;  %v89_v3 = vadd.s32 4294967199, %v22_v2  ;;  %vm37_vm1 = vcmp.eq.s32.totalorder %v22_v2, 32  ;;  %s64_s26 = sshll.u32 %s166_s25, 4  ;;  %v42_v8 = vld [vmem:[%s268_s2] sm:$0x3]  ;;  %s167_s1 = smov [#allocation2]   ;;  %s65_s26 = int_to_ptr.vmem [resolvable:$true] %s64_s26 }
   0x4   :  { %30 = vperm.xlu0 %94, %v23_v0   ;;  %v28_v7 = vand.u32 127, %v27_v5  ;;  %s54_s29 = sshll.u32 %s167_s1, 4  ;;  %v45_v10 = vld [vmem:[%s269_s3] sm:$0x3]  ;;  %vm40_vm2 = vcmask 58368   ;;  %s168_s0 = smov [#allocation6]   ;;  %s216_s29 = int_to_ptr.vmem [resolvable:$true] %s54_s29 }
   0x5   :  { %v35_v4 = vadd.s32 2, %v89_v3  ;;  %vm34_vm0 = vcmp.le.u32.totalorder %v89_v3, 25  ;;  %s74_s8 = sshll.u32 %s168_s0, 4  ;;  %s95_s2 = scalar_lea.vmem %s65_s26, 32  ;;  %s218_s8 = int_to_ptr.vmem [resolvable:$true] %s74_s8 }
   0x6   :  { %p96_p0 = scmp.ne.s32.totalorder %s65_s26, %s95_s2  ;;  %p100_p1 = scmp.lt.s32.totalorder %s65_s26, %s65_s26 }
   0x7   :  { %v36_v6 = vsel %vm34_vm0, %v35_v4, 0  ;;  %p101_p2 = scmp.lt.s32.totalorder %s95_s2, %s95_s2 }
   0x8   :  { %v38_v9 = vsel %vm37_vm1, 28, %v36_v6 }
   0x9   :  { %p102_p3 = por %p101_p2, %p100_p1 }
   0xb   :  { %p103_p4 = pnand %p102_p3, %p96_p0 }
  0x83   :  { %v31_v11 = vpop.permute.xlu0 %30 }
  0x84   :  { %vm32_vm3 = vcmp.lt.s32.totalorder %v28_v7, %v31_v11 }
  0x85   :  { %v43_v12 = vsel %vm32_vm3, %v42_v8, 4294967295  ;;  %v39_v13 = vsel %vm32_vm3, %v38_v9, 1  ;;  %v46_v14 = vsel %vm32_vm3, %v45_v10, 4294967295 }
  0x86   :  { %44 = vst.msk [vmem:[#allocation4] sm:$0x3] %vm40_vm2, %v43_v12  ;;  %41 = vst.msk [vmem:[#allocation2] sm:$0x3] %vm40_vm2, %v39_v13 }
  0x87   :  { %47 = vst.msk [vmem:[#allocation6] sm:$0x3] %vm40_vm2, %v46_v14 }
  0x88   :  { %106 = shalt.err (!%p103_p4)
}
  0x89   :  { %s107_s10 = scalar_lea.hbm %s271_s5, 32 }
  0x8a   :  { %p108_p5 = scmp.ne.s32.totalorder %s271_s5, %s107_s10  ;;  %p111_p6 = scmp.lt.u32.totalorder %s107_s10, %s271_s5 }
  0x8c   :  { %p113_p7 = pnand %p111_p6, %p108_p5 }
  0x8e   :  { %116 = shalt.err (!%p113_p7)
}
  0x8f   :  { %67 = dma.vmem_to_hbm [thread:$0]  %s65_s26, 32, %s271_s5, [#allocation5]  }
  0x90   :  { %s117_s17 = scalar_lea.vmem %s216_s29, 32  ;;  %p122_p9 = scmp.lt.s32.totalorder %s216_s29, %s216_s29 }
  0x91   :  { %p118_p8 = scmp.ne.s32.totalorder %s216_s29, %s117_s17  ;;  %p123_p10 = scmp.lt.s32.totalorder %s117_s17, %s117_s17 }
  0x93   :  { %p124_p11 = por %p123_p10, %p122_p9 }
  0x95   :  { %p125_p12 = pnand %p124_p11, %p118_p8 }
  0x97   :  { %128 = shalt.err (!%p125_p12)
}
  0x98   :  { %s129_s20 = scalar_lea.hbm %s270_s4, 32 }
  0x99   :  { %p130_p13 = scmp.ne.s32.totalorder %s270_s4, %s129_s20  ;;  %p133_p0 = scmp.lt.u32.totalorder %s129_s20, %s270_s4 }
  0x9b   :  { %p135_p1 = pnand %p133_p0, %p130_p13 }
  0x9d   :  { %138 = shalt.err (!%p135_p1)
}
  0x9e   :  { %57 = dma.vmem_to_hbm [thread:$0]  %s216_s29, 32, %s270_s4, [#allocation3]  }
  0x9f   :  { %s139_s26 = scalar_lea.vmem %s218_s8, 32  ;;  %p144_p3 = scmp.lt.s32.totalorder %s218_s8, %s218_s8 }
  0xa0   :  { %p140_p2 = scmp.ne.s32.totalorder %s218_s8, %s139_s26  ;;  %p145_p4 = scmp.lt.s32.totalorder %s139_s26, %s139_s26 }
  0xa2   :  { %p146_p5 = por %p145_p4, %p144_p3 }
  0xa4   :  { %p147_p6 = pnand %p146_p5, %p140_p2 }
  0xa6   :  { %150 = shalt.err (!%p147_p6)
}
  0xa7   :  { %s151_s1 = scalar_lea.hbm %s272_s6, 32 }
  0xa8   :  { %p152_p7 = scmp.ne.s32.totalorder %s272_s6, %s151_s1  ;;  %p155_p8 = scmp.lt.u32.totalorder %s151_s1, %s272_s6 }
  0xaa   :  { %p157_p9 = pnand %p155_p8, %p152_p7 }
  0xac   :  { %160 = shalt.err (!%p157_p9)
}
  0xad   :  { %77 = dma.vmem_to_hbm [thread:$0]  %s218_s8, 32, %s272_s6, [#allocation5]  }
  0xae   :  { %161 = dma.done.wait [#allocation3], 32  }
  0xaf   :  { %162 = vsyncadd [#allocation3], 4294967264 }
  0xb0   :  { %163 = dma.done.wait [#allocation5], 64  }
  0xb1   :  { %164 = vsyncadd [#allocation5], 4294967232 }
  0xb2   :  { %87 = vsyncpa [#allocation3], 1 }
  0xb3   :  { %88 = vsyncpa [#allocation5], 1 }

</bundles_post_ra>
